<compile_context>
chip_gen: v7x
topology: tpu7x:2x2x1
jax: 0.10.0
libtpu: 0.0.40
codegen_flags: <defaults>
</compile_context>

<pallas_src>
import jax
import jax.numpy as jnp
from jax.experimental import pallas as pl
from jax.experimental.pallas import tpu as pltpu


def _swap_last_two_kernel(x_ref, o_ref):
    # x block (..., TL, TD)  ->  o block (..., TD, TL); works for 2D & 3D tiles.
    o_ref[...] = jnp.swapaxes(x_ref[...], -1, -2)


def _round_up(x, m):
    return ((x + m - 1) // m) * m


def _pick_tile(axis, target):
    """Tile for one trailing axis: full axis if it fits in `target`, otherwise
    the multiple of 128 (<= target) minimizing last-tile padding (ties -> larger)."""
    if axis <= target:
        return axis
    candidates = [t for t in (1024, 512, 384, 256, 128) if t <= target]
    best = candidates[0]
    best_waste = pl.cdiv(axis, best) * best - axis
    for t in candidates[1:]:
        waste = pl.cdiv(axis, t) * t - axis
        if waste < best_waste:
            best, best_waste = t, waste
    return best


def _transpose_last_two(x3):
    """Tiled (B, M, N) -> (B, N, M) transpose."""
    B, M, N = x3.shape
    itemsize = jnp.dtype(x3.dtype).itemsize

    # Tiny trailing planes would force lane-sparse masked output stores
    # (e.g. 16/128 lane density). XLA handles those near roofline -> fall back.
    if min(M, N) < 128:
        return jnp.swapaxes(x3, -1, -2)

    # Large tiles: 1024 for >=16-bit dtypes, 512 for 8-bit.
    target = 1024 if itemsize >= 2 else 512
    TL = _pick_tile(M, target)  # tile along M (input sublanes, output lanes)
    TD = _pick_tile(N, target)  # tile along N (input lanes, output sublanes)

    # Padded-VMEM footprint of one (TL, TD) plane and its transposed output.
    sub_min = {4: 8, 2: 16, 1: 32}.get(itemsize, 8)
    in_plane = _round_up(TL, sub_min) * _round_up(TD, 128) * itemsize
    out_plane = _round_up(TD, sub_min) * _round_up(TL, 128) * itemsize
    plane_padded = max(in_plane, out_plane)

    # Batch several planes per step only while each buffer stays <= ~2 MiB.
    TB = int(min(B, max(1, (2 << 20) // max(plane_padded, 1))))

    bt = pl.cdiv(B, TB)
    jt = pl.cdiv(N, TD)
    it = pl.cdiv(M, TL)

    batch_block = None if TB == 1 else TB  # squeeze size-1 batch tile

    # Keep the M-tile axis innermost (row-major, lane-dense output writes);
    # lead with the larger of the batch/N tile counts for megacore sharding.
    if bt >= jt:
        grid = (bt, jt, it)
        in_idx = lambda b, j, i: (b, i, j)
        out_idx = lambda b, j, i: (b, j, i)
    else:
        grid = (jt, bt, it)
        in_idx = lambda j, b, i: (b, i, j)
        out_idx = lambda j, b, i: (b, j, i)

    in_spec = pl.BlockSpec((batch_block, TL, TD), in_idx)
    out_spec = pl.BlockSpec((batch_block, TD, TL), out_idx)

    # Scoped-VMEM budget from padded, double-buffered in+out blocks + headroom.
    in_block = TB * in_plane
    out_block = TB * out_plane
    vmem_limit = int(min(max(2 * (in_block + out_block) + (8 << 20), 32 << 20),
                         48 << 20))

    return pl.pallas_call(
        _swap_last_two_kernel,
        out_shape=jax.ShapeDtypeStruct((B, N, M), x3.dtype),
        grid_spec=pl.GridSpec(
            grid=grid,
            in_specs=[in_spec],
            out_specs=out_spec,
        ),
        compiler_params=pltpu.CompilerParams(
            dimension_semantics=("parallel", "parallel", "parallel"),
            vmem_limit_bytes=vmem_limit,
        ),
    )(x3)


def permute_tf(x):
    """Pallas equivalent of permuteTF.forward: swap last two dims for 3D/4D."""
    if x.ndim == 3:
        # (B, L, D) -> (B, D, L)
        return _transpose_last_two(x)
    elif x.ndim == 4:
        # (B, C, H, W) -> (B, C, W, H); collapse B*C (free reshape).
        B, C, H, W = x.shape
        y = _transpose_last_two(x.reshape(B * C, H, W))
        return y.reshape(B, C, W, H)
    # Other ranks pass through unchanged (matches the PyTorch module).
    return x


if __name__ == "__main__":
    key = jax.random.PRNGKey(0)
    k1, k2, k3, k4, k5, k6 = jax.random.split(key, 6)

    # 4D spec-shape case: (B, C, H, W) -> (B, C, W, H)  (tiny plane -> XLA path)
    x4 = jax.random.normal(k1, (2, 4, 16, 16), dtype=jnp.float32)
    y4 = jax.block_until_ready(permute_tf(x4))
    assert y4.shape == (2, 4, 16, 16)
    assert jnp.array_equal(y4, jnp.transpose(x4, (0, 1, 3, 2)))

    # 3D tiny case: (B, L, D) -> (B, D, L)  (tiny plane -> XLA path)
    x3 = jax.random.normal(k2, (2, 8, 32), dtype=jnp.float32)
    y3 = jax.block_until_ready(permute_tf(x3))
    assert y3.shape == (2, 32, 8)
    assert jnp.array_equal(y3, jnp.transpose(x3, (0, 2, 1)))

    # Pallas path, full-extent tiles in a single grid step.
    xa = jax.random.normal(k3, (1, 520, 200), dtype=jnp.float32)
    ya = jax.block_until_ready(permute_tf(xa))
    assert ya.shape == (1, 200, 520)
    assert jnp.array_equal(ya, jnp.transpose(xa, (0, 2, 1)))

    # Pallas path, ragged tiled axis (M > 1024 -> TL=384, 3 M-tiles).
    xb = jax.random.normal(k4, (1, 1100, 256), dtype=jnp.float32)
    yb = jax.block_until_ready(permute_tf(xb))
    assert yb.shape == (1, 256, 1100)
    assert jnp.array_equal(yb, jnp.transpose(xb, (0, 2, 1)))

    # Pallas path, bf16 (sub-32-bit tiles) with plane batching (TB > 1).
    xc = jax.random.normal(k5, (2, 256, 384), dtype=jnp.float32).astype(jnp.bfloat16)
    yc = jax.block_until_ready(permute_tf(xc))
    assert yc.shape == (2, 384, 256)
    assert jnp.array_equal(yc, jnp.transpose(xc, (0, 2, 1)))

    # Pallas path, 4D with collapsed batch axis and TB > 1.
    xd = jax.random.normal(k6, (2, 2, 128, 256), dtype=jnp.float32)
    yd = jax.block_until_ready(permute_tf(xd))
    assert yd.shape == (2, 2, 256, 128)
    assert jnp.array_equal(yd, jnp.transpose(xd, (0, 1, 3, 2)))

    print("KERNEL_OK")
</pallas_src>

<mosaic_0001>
module attributes {stable_mosaic.version = 11 : i64} {
  func.func @_swap_last_two_kernel(%arg0: i32, %arg1: i32, %arg2: i32, %arg3: memref<1x520x200xf32, #tpu.memory_space<vmem>>, %arg4: memref<1x200x520xf32, #tpu.memory_space<vmem>>) attributes {dimension_semantics = [#tpu.dimension_semantics<parallel>, #tpu.dimension_semantics<parallel>, #tpu.dimension_semantics<parallel>], iteration_bounds = array<i64: 1, 1, 1>, scalar_prefetch = 0 : i64, scratch_operands = 0 : i64, tpu.core_type = #tpu.core_type<tc>, window_params = [{transform_indices = @transform_0, window_bounds = array<i64: 1, 520, 200>}, {transform_indices = @transform_1, window_bounds = array<i64: 1, 200, 520>}]} {
    %c0 = arith.constant 0 : index
    %c0_0 = arith.constant 0 : index
    %c0_1 = arith.constant 0 : index
    %0 = vector.load %arg3[%c0, %c0_0, %c0_1] : memref<1x520x200xf32, #tpu.memory_space<vmem>>, vector<1x520x200xf32>
    %1 = vector.shape_cast %0 : vector<1x520x200xf32> to vector<520x200xf32>
    %2 = tpu.transpose %1, [1, 0] : vector<520x200xf32> -> vector<200x520xf32>
    %c0_2 = arith.constant 0 : index
    %c0_3 = arith.constant 0 : index
    %c0_4 = arith.constant 0 : index
    %3 = vector.load %arg4[%c0_2, %c0_3, %c0_4] : memref<1x200x520xf32, #tpu.memory_space<vmem>>, vector<1x200x520xf32>
    %4 = vector.shape_cast %3 : vector<1x200x520xf32> to vector<200x520xf32>
    %5 = vector.shape_cast %2 : vector<200x520xf32> to vector<1x200x520xf32>
    tpu.vector_store %arg4[%c0_2, %c0_3, %c0_4], %5 {strides = array<i32>} : memref<1x200x520xf32, #tpu.memory_space<vmem>>, vector<1x200x520xf32>,
    return
  }
  func.func @transform_0(%arg0: i32, %arg1: i32, %arg2: i32) -> (i32, i32, i32) {
    %c0_i32 = arith.constant 0 : i32
    return %arg0, %arg2, %arg1 : i32, i32, i32
  }
  func.func @transform_1(%arg0: i32, %arg1: i32, %arg2: i32) -> (i32, i32, i32) {
    %c0_i32 = arith.constant 0 : i32
    return %arg0, %arg1, %arg2 : i32, i32, i32
  }
}

</mosaic_0001>

<bundles_post_ra>
// kernel: tpu_custom_call.1
= control target key start
LH: loop header
LB: loop body
LE: loop exit
PB: predicated region body
PF: predicated region fallthrough
CT: control target
= control target key end

     0   :  { %s1069_s0 = inlined_call_operand.vmem [shape: f32[1,520,200], index: 0, kind: input, shape index: {}]   ;;  %s1070_s1 = inlined_call_operand.hbm [shape: f32[1,200,520], index: 1, kind: output, shape index: {}]  }
   0x1   :  { %v10_v0 = vld [vmem:[%s1069_s0 + $0x8] sm:$0xff]  ;;  %v9_v1 = vld [vmem:[%s1069_s0] sm:$0xff]  ;;  %v12_v2 = vld [vmem:[%s1069_s0 + $0x18] sm:$0xff] }
   0x2   :  { %171 = vxpose.xlu1.b32.start [1/16] (narrow) %v10_v0, 72  ;;  %139 = vxpose.xlu0.b32.start [1/16] %v9_v1, 128  ;;  %v11_v3 = vld [vmem:[%s1069_s0 + $0x10] sm:$0xff]  ;;  %v14_v4 = vld [vmem:[%s1069_s0 + $0x28] sm:$0xff]  ;;  %v13_v5 = vld [vmem:[%s1069_s0 + $0x20] sm:$0xff] }
   0x3   :  { %v16_v6 = vld [vmem:[%s1069_s0 + $0x38] sm:$0xff]  ;;  %v15_v7 = vld [vmem:[%s1069_s0 + $0x30] sm:$0xff]  ;;  %v18_v8 = vld [vmem:[%s1069_s0 + $0x48] sm:$0xff] }
   0x4   :  { %v17_v9 = vld [vmem:[%s1069_s0 + $0x40] sm:$0xff]  ;;  %v20_v10 = vld [vmem:[%s1069_s0 + $0x58] sm:$0xff]  ;;  %v19_v11 = vld [vmem:[%s1069_s0 + $0x50] sm:$0xff] }
   0x5   :  { %v22_v12 = vld [vmem:[%s1069_s0 + $0x68] sm:$0xff]  ;;  %v21_v13 = vld [vmem:[%s1069_s0 + $0x60] sm:$0xff]  ;;  %v24_v14 = vld [vmem:[%s1069_s0 + $0x78] sm:$0xff] }
   0x6   :  { %172 = vxpose.xlu1.b32.cont [2/16] (narrow) %v12_v2, 72  ;;  %140 = vxpose.xlu0.b32.cont [2/16] %v11_v3, 128  ;;  %v23_v15 = vld [vmem:[%s1069_s0 + $0x70] sm:$0xff] }
   0xa   :  { %173 = vxpose.xlu1.b32.cont [3/16] (narrow) %v14_v4, 72  ;;  %141 = vxpose.xlu0.b32.cont [3/16] %v13_v5, 128 }
   0xe   :  { %174 = vxpose.xlu1.b32.cont [4/16] (narrow) %v16_v6, 72  ;;  %142 = vxpose.xlu0.b32.cont [4/16] %v15_v7, 128 }
  0x12   :  { %175 = vxpose.xlu1.b32.cont [5/16] (narrow) %v18_v8, 72  ;;  %143 = vxpose.xlu0.b32.cont [5/16] %v17_v9, 128 }
  0x16   :  { %176 = vxpose.xlu1.b32.cont [6/16] (narrow) %v20_v10, 72  ;;  %144 = vxpose.xlu0.b32.cont [6/16] %v19_v11, 128 }
  0x1a   :  { %177 = vxpose.xlu1.b32.cont [7/16] (narrow) %v22_v12, 72  ;;  %145 = vxpose.xlu0.b32.cont [7/16] %v21_v13, 128 }
  0x1b   :  { %6 = vsyncpa [#allocation3], 0  ;;  %v26_v16 = vld [vmem:[%s1069_s0 + $0x88] sm:$0xff]  ;;  %v25_v17 = vld [vmem:[%s1069_s0 + $0x80] sm:$0xff]  ;;  %vm463_vm0 = vcmask 64512  }
  0x1c   :  { %v28_v18 = vld [vmem:[%s1069_s0 + $0x98] sm:$0xff]  ;;  %v27_v19 = vld [vmem:[%s1069_s0 + $0x90] sm:$0xff]  ;;  %v30_v20 = vld [vmem:[%s1069_s0 + $0xa8] sm:$0xff] }
  0x1d   :  { %v29_v21 = vld [vmem:[%s1069_s0 + $0xa0] sm:$0xff]  ;;  %v32_v22 = vld [vmem:[%s1069_s0 + $0xb8] sm:$0xff]  ;;  %v31_v23 = vld [vmem:[%s1069_s0 + $0xb0] sm:$0xff] }
  0x1e   :  { %178 = vxpose.xlu1.b32.cont [8/16] (narrow) %v24_v14, 72  ;;  %146 = vxpose.xlu0.b32.cont [8/16] %v23_v15, 128  ;;  %v34_v24 = vld [vmem:[%s1069_s0 + $0xc8] sm:$0xff]  ;;  %v33_v25 = vld [vmem:[%s1069_s0 + $0xc0] sm:$0xff]  ;;  %v36_v26 = vld [vmem:[%s1069_s0 + $0xd8] sm:$0xff] }
  0x1f   :  { %v35_v27 = vld [vmem:[%s1069_s0 + $0xd0] sm:$0xff]  ;;  %v38_v28 = vld [vmem:[%s1069_s0 + $0xe8] sm:$0xff]  ;;  %v37_v29 = vld [vmem:[%s1069_s0 + $0xe0] sm:$0xff] }
  0x20   :  { %v40_v30 = vld [vmem:[%s1069_s0 + $0xf8] sm:$0xff]  ;;  %v39_v31 = vld [vmem:[%s1069_s0 + $0xf0] sm:$0xff]  ;;  %v42_v32 = vld [vmem:[%s1069_s0 + $0x108] sm:$0xff] }
  0x21   :  { %v41_v33 = vld [vmem:[%s1069_s0 + $0x100] sm:$0xff]  ;;  %v44_v34 = vld [vmem:[%s1069_s0 + $0x118] sm:$0xff]  ;;  %v43_v35 = vld [vmem:[%s1069_s0 + $0x110] sm:$0xff] }
  0x22   :  { %179 = vxpose.xlu1.b32.cont [9/16] (narrow) %v26_v16, 72  ;;  %147 = vxpose.xlu0.b32.cont [9/16] %v25_v17, 128  ;;  %v46_v36 = vld [vmem:[%s1069_s0 + $0x128] sm:$0xff]  ;;  %v45_v37 = vld [vmem:[%s1069_s0 + $0x120] sm:$0xff]  ;;  %v48_v38 = vld [vmem:[%s1069_s0 + $0x138] sm:$0xff] }
  0x23   :  { %v47_v39 = vld [vmem:[%s1069_s0 + $0x130] sm:$0xff]  ;;  %v50_v40 = vld [vmem:[%s1069_s0 + $0x148] sm:$0xff]  ;;  %v49_v41 = vld [vmem:[%s1069_s0 + $0x140] sm:$0xff] }
  0x24   :  { %v52_v42 = vld [vmem:[%s1069_s0 + $0x158] sm:$0xff]  ;;  %v51_v43 = vld [vmem:[%s1069_s0 + $0x150] sm:$0xff]  ;;  %v54_v44 = vld [vmem:[%s1069_s0 + $0x168] sm:$0xff] }
  0x25   :  { %v53_v45 = vld [vmem:[%s1069_s0 + $0x160] sm:$0xff]  ;;  %v56_v46 = vld [vmem:[%s1069_s0 + $0x178] sm:$0xff]  ;;  %v55_v47 = vld [vmem:[%s1069_s0 + $0x170] sm:$0xff] }
  0x26   :  { %180 = vxpose.xlu1.b32.cont [10/16] (narrow) %v28_v18, 72  ;;  %148 = vxpose.xlu0.b32.cont [10/16] %v27_v19, 128  ;;  %v58_v48 = vld [vmem:[%s1069_s0 + $0x188] sm:$0xff]  ;;  %v57_v49 = vld [vmem:[%s1069_s0 + $0x180] sm:$0xff]  ;;  %v60_v50 = vld [vmem:[%s1069_s0 + $0x198] sm:$0xff] }
  0x27   :  { %v59_v51 = vld [vmem:[%s1069_s0 + $0x190] sm:$0xff]  ;;  %v62_v52 = vld [vmem:[%s1069_s0 + $0x1a8] sm:$0xff]  ;;  %v61_v53 = vld [vmem:[%s1069_s0 + $0x1a0] sm:$0xff] }
  0x28   :  { %v64_v54 = vld [vmem:[%s1069_s0 + $0x1b8] sm:$0xff]  ;;  %v63_v55 = vld [vmem:[%s1069_s0 + $0x1b0] sm:$0xff]  ;;  %v66_v56 = vld [vmem:[%s1069_s0 + $0x1c8] sm:$0xff] }
  0x29   :  { %v65_v57 = vld [vmem:[%s1069_s0 + $0x1c0] sm:$0xff]  ;;  %v68_v58 = vld [vmem:[%s1069_s0 + $0x1d8] sm:$0xff]  ;;  %v67_v59 = vld [vmem:[%s1069_s0 + $0x1d0] sm:$0xff] }
  0x2a   :  { %181 = vxpose.xlu1.b32.cont [11/16] (narrow) %v30_v20, 72  ;;  %149 = vxpose.xlu0.b32.cont [11/16] %v29_v21, 128  ;;  %v70_v60 = vld [vmem:[%s1069_s0 + $0x1e8] sm:$0xff]  ;;  %v69_v61 = vld [vmem:[%s1069_s0 + $0x1e0] sm:$0xff]  ;;  %v72_v62 = vld [vmem:[%s1069_s0 + $0x1f8] sm:$0xff] }
  0x2b   :  { %v71_v63 = vld [vmem:[%s1069_s0 + $0x1f0] sm:$0xff]  ;;  %v74_v0 = vld [vmem:[%s1069_s0 + $0x208] sm:$0xff]  ;;  %v73_v1 = vld [vmem:[%s1069_s0 + $0x200] sm:$0xff] }
  0x2c   :  { %v76_v4 = vld [vmem:[%s1069_s0 + $0x218] sm:$0xff]  ;;  %v75_v5 = vld [vmem:[%s1069_s0 + $0x210] sm:$0xff]  ;;  %v78_v8 = vld [vmem:[%s1069_s0 + $0x228] sm:$0xff] }
  0x2d   :  { %v77_v9 = vld [vmem:[%s1069_s0 + $0x220] sm:$0xff]  ;;  %v80_v12 = vld [vmem:[%s1069_s0 + $0x238] sm:$0xff]  ;;  %v79_v13 = vld [vmem:[%s1069_s0 + $0x230] sm:$0xff] }
  0x2e   :  { %182 = vxpose.xlu1.b32.cont [12/16] (narrow) %v32_v22, 72  ;;  %150 = vxpose.xlu0.b32.cont [12/16] %v31_v23, 128  ;;  %v82_v16 = vld [vmem:[%s1069_s0 + $0x248] sm:$0xff]  ;;  %v81_v17 = vld [vmem:[%s1069_s0 + $0x240] sm:$0xff]  ;;  %v84_v20 = vld [vmem:[%s1069_s0 + $0x258] sm:$0xff] }
  0x2f   :  { %v83_v21 = vld [vmem:[%s1069_s0 + $0x250] sm:$0xff] }
  0x32   :  { %183 = vxpose.xlu1.b32.cont [13/16] (narrow) %v34_v24, 72  ;;  %151 = vxpose.xlu0.b32.cont [13/16] %v33_v25, 128  ;;  %v86_v24 = vld [vmem:[%s1069_s0 + $0x268] sm:$0xff]  ;;  %v85_v25 = vld [vmem:[%s1069_s0 + $0x260] sm:$0xff] }
  0x36   :  { %184 = vxpose.xlu1.b32.cont [14/16] (narrow) %v36_v26, 72  ;;  %152 = vxpose.xlu0.b32.cont [14/16] %v35_v27, 128 }
  0x3a   :  { %185 = vxpose.xlu1.b32.cont [15/16] (narrow) %v38_v28, 72  ;;  %153 = vxpose.xlu0.b32.cont [15/16] %v37_v29, 128  ;;  %v88_v28 = vld [vmem:[%s1069_s0 + $0x278] sm:$0xff]  ;;  %v87_v29 = vld [vmem:[%s1069_s0 + $0x270] sm:$0xff] }
  0x3e   :  { %186 = vxpose.xlu1.b32.end [16/16] (narrow) %v40_v30, 72  ;;  %154 = vxpose.xlu0.b32.end [16/16] %v39_v31, 128 }
  0x42   :  { %235 = vxpose.xlu1.b32.start [1/16] (narrow) %v42_v32, 72  ;;  %203 = vxpose.xlu0.b32.start [1/16] %v41_v33, 128  ;;  %v90_v32 = vld [vmem:[%s1069_s0 + $0x288] sm:$0xff]  ;;  %v89_v33 = vld [vmem:[%s1069_s0 + $0x280] sm:$0xff] }
  0x46   :  { %236 = vxpose.xlu1.b32.cont [2/16] (narrow) %v44_v34, 72  ;;  %204 = vxpose.xlu0.b32.cont [2/16] %v43_v35, 128 }
  0x4a   :  { %237 = vxpose.xlu1.b32.cont [3/16] (narrow) %v46_v36, 72  ;;  %205 = vxpose.xlu0.b32.cont [3/16] %v45_v37, 128  ;;  %v92_v36 = vld [vmem:[%s1069_s0 + $0x298] sm:$0xff]  ;;  %v91_v37 = vld [vmem:[%s1069_s0 + $0x290] sm:$0xff] }
  0x4e   :  { %238 = vxpose.xlu1.b32.cont [4/16] (narrow) %v48_v38, 72  ;;  %206 = vxpose.xlu0.b32.cont [4/16] %v47_v39, 128  ;;  %v94_v39 = vld [vmem:[%s1069_s0 + $0x2a8] sm:$0xff] }
  0x52   :  { %239 = vxpose.xlu1.b32.cont [5/16] (narrow) %v50_v40, 72  ;;  %207 = vxpose.xlu0.b32.cont [5/16] %v49_v41, 128  ;;  %v93_v40 = vld [vmem:[%s1069_s0 + $0x2a0] sm:$0xff] }
  0x56   :  { %240 = vxpose.xlu1.b32.cont [6/16] (narrow) %v52_v42, 72  ;;  %208 = vxpose.xlu0.b32.cont [6/16] %v51_v43, 128  ;;  %v96_v42 = vld [vmem:[%s1069_s0 + $0x2b8] sm:$0xff]  ;;  %v95_v43 = vld [vmem:[%s1069_s0 + $0x2b0] sm:$0xff] }
  0x5a   :  { %241 = vxpose.xlu1.b32.cont [7/16] (narrow) %v54_v44, 72  ;;  %209 = vxpose.xlu0.b32.cont [7/16] %v53_v45, 128  ;;  %v98_v45 = vld [vmem:[%s1069_s0 + $0x2c8] sm:$0xff] }
  0x5e   :  { %242 = vxpose.xlu1.b32.cont [8/16] (narrow) %v56_v46, 72  ;;  %210 = vxpose.xlu0.b32.cont [8/16] %v55_v47, 128  ;;  %v97_v46 = vld [vmem:[%s1069_s0 + $0x2c0] sm:$0xff] }
  0x62   :  { %243 = vxpose.xlu1.b32.cont [9/16] (narrow) %v58_v48, 72  ;;  %211 = vxpose.xlu0.b32.cont [9/16] %v57_v49, 128  ;;  %v100_v48 = vld [vmem:[%s1069_s0 + $0x2d8] sm:$0xff]  ;;  %v99_v49 = vld [vmem:[%s1069_s0 + $0x2d0] sm:$0xff] }
  0x66   :  { %244 = vxpose.xlu1.b32.cont [10/16] (narrow) %v60_v50, 72  ;;  %212 = vxpose.xlu0.b32.cont [10/16] %v59_v51, 128  ;;  %v102_v51 = vld [vmem:[%s1069_s0 + $0x2e8] sm:$0xff] }
  0x6a   :  { %245 = vxpose.xlu1.b32.cont [11/16] (narrow) %v62_v52, 72  ;;  %213 = vxpose.xlu0.b32.cont [11/16] %v61_v53, 128  ;;  %v101_v52 = vld [vmem:[%s1069_s0 + $0x2e0] sm:$0xff] }
  0x6e   :  { %246 = vxpose.xlu1.b32.cont [12/16] (narrow) %v64_v54, 72  ;;  %214 = vxpose.xlu0.b32.cont [12/16] %v63_v55, 128  ;;  %v104_v54 = vld [vmem:[%s1069_s0 + $0x2f8] sm:$0xff]  ;;  %v103_v55 = vld [vmem:[%s1069_s0 + $0x2f0] sm:$0xff] }
  0x72   :  { %247 = vxpose.xlu1.b32.cont [13/16] (narrow) %v66_v56, 72  ;;  %215 = vxpose.xlu0.b32.cont [13/16] %v65_v57, 128  ;;  %v137_v57 = vld [vmem:[%s1069_s0 + $0x400] sm:$0xff] }
  0x76   :  { %248 = vxpose.xlu1.b32.cont [14/16] (narrow) %v68_v58, 72  ;;  %216 = vxpose.xlu0.b32.cont [14/16] %v67_v59, 128  ;;  %v105_v58 = vld [vmem:[%s1069_s0 + $0x300] sm:$0xff] }
  0x7a   :  { %249 = vxpose.xlu1.b32.cont [15/16] (narrow) %v70_v60, 72  ;;  %217 = vxpose.xlu0.b32.cont [15/16] %v69_v61, 128  ;;  %v107_v61 = vld [vmem:[%s1069_s0 + $0x310] sm:$0xff] }
  0x7e   :  { %250 = vxpose.xlu1.b32.end [16/16] (narrow) %v72_v62, 72  ;;  %218 = vxpose.xlu0.b32.end [16/16] %v71_v63, 128 }
  0x82   :  { %299 = vxpose.xlu1.b32.start [1/16] (narrow) %v74_v0, 72  ;;  %267 = vxpose.xlu0.b32.start [1/16] %v73_v1, 128  ;;  %v155_v2 = vpop.trf.xlu0  ;;  %v187_v3 = vpop.trf.xlu1  ;;  %v109_v0 = vld [vmem:[%s1069_s0 + $0x320] sm:$0xff] }
  0x83   :  { %459 = vst [vmem:[#allocation2] sm:$0xff] %v155_v2  ;;  %540 = vst [vmem:[#allocation2 + $0x280] sm:$0xff] %v187_v3  ;;  %v111_v3 = vld [vmem:[%s1069_s0 + $0x330] sm:$0xff] }
  0x86   :  { %300 = vxpose.xlu1.b32.cont [2/16] (narrow) %v76_v4, 72  ;;  %268 = vxpose.xlu0.b32.cont [2/16] %v75_v5, 128  ;;  %v156_v6 = vpop.trf.xlu0  ;;  %v188_v7 = vpop.trf.xlu1 }
  0x87   :  { %465 = vst [vmem:[#allocation2 + $0x28] sm:$0xff] %v156_v6  ;;  %545 = vst [vmem:[#allocation2 + $0x2a8] sm:$0xff] %v188_v7  ;;  %v113_v6 = vld [vmem:[%s1069_s0 + $0x340] sm:$0xff] }
  0x8a   :  { %301 = vxpose.xlu1.b32.cont [3/16] (narrow) %v78_v8, 72  ;;  %269 = vxpose.xlu0.b32.cont [3/16] %v77_v9, 128  ;;  %v157_v10 = vpop.trf.xlu0  ;;  %v189_v11 = vpop.trf.xlu1  ;;  %v115_v9 = vld [vmem:[%s1069_s0 + $0x350] sm:$0xff] }
  0x8b   :  { %470 = vst [vmem:[#allocation2 + $0x50] sm:$0xff] %v157_v10  ;;  %550 = vst [vmem:[#allocation2 + $0x2d0] sm:$0xff] %v189_v11 }
  0x8e   :  { %302 = vxpose.xlu1.b32.cont [4/16] (narrow) %v80_v12, 72  ;;  %270 = vxpose.xlu0.b32.cont [4/16] %v79_v13, 128  ;;  %v158_v14 = vpop.trf.xlu0  ;;  %v190_v15 = vpop.trf.xlu1  ;;  %v117_v12 = vld [vmem:[%s1069_s0 + $0x360] sm:$0xff] }
  0x8f   :  { %475 = vst [vmem:[#allocation2 + $0x78] sm:$0xff] %v158_v14  ;;  %555 = vst [vmem:[#allocation2 + $0x2f8] sm:$0xff] %v190_v15  ;;  %v119_v15 = vld [vmem:[%s1069_s0 + $0x370] sm:$0xff] }
  0x92   :  { %303 = vxpose.xlu1.b32.cont [5/16] (narrow) %v82_v16, 72  ;;  %271 = vxpose.xlu0.b32.cont [5/16] %v81_v17, 128  ;;  %v159_v18 = vpop.trf.xlu0  ;;  %v191_v19 = vpop.trf.xlu1 }
  0x93   :  { %480 = vst [vmem:[#allocation2 + $0xa0] sm:$0xff] %v159_v18  ;;  %560 = vst [vmem:[#allocation2 + $0x320] sm:$0xff] %v191_v19  ;;  %v121_v18 = vld [vmem:[%s1069_s0 + $0x380] sm:$0xff] }
  0x96   :  { %304 = vxpose.xlu1.b32.cont [6/16] (narrow) %v84_v20, 72  ;;  %272 = vxpose.xlu0.b32.cont [6/16] %v83_v21, 128  ;;  %v160_v22 = vpop.trf.xlu0  ;;  %v192_v23 = vpop.trf.xlu1  ;;  %v123_v21 = vld [vmem:[%s1069_s0 + $0x390] sm:$0xff] }
  0x97   :  { %485 = vst [vmem:[#allocation2 + $0xc8] sm:$0xff] %v160_v22  ;;  %565 = vst [vmem:[#allocation2 + $0x348] sm:$0xff] %v192_v23  ;;  %v125_v23 = vld [vmem:[%s1069_s0 + $0x3a0] sm:$0xff] }
  0x9a   :  { %305 = vxpose.xlu1.b32.cont [7/16] (narrow) %v86_v24, 72  ;;  %273 = vxpose.xlu0.b32.cont [7/16] %v85_v25, 128  ;;  %v161_v26 = vpop.trf.xlu0  ;;  %v193_v27 = vpop.trf.xlu1  ;;  %v127_v25 = vld [vmem:[%s1069_s0 + $0x3b0] sm:$0xff] }
  0x9b   :  { %490 = vst [vmem:[#allocation2 + $0xf0] sm:$0xff] %v161_v26  ;;  %570 = vst [vmem:[#allocation2 + $0x370] sm:$0xff] %v193_v27  ;;  %v129_v27 = vld [vmem:[%s1069_s0 + $0x3c0] sm:$0xff] }
  0x9e   :  { %306 = vxpose.xlu1.b32.cont [8/16] (narrow) %v88_v28, 72  ;;  %274 = vxpose.xlu0.b32.cont [8/16] %v87_v29, 128  ;;  %v162_v30 = vpop.trf.xlu0  ;;  %v194_v31 = vpop.trf.xlu1  ;;  %v131_v29 = vld [vmem:[%s1069_s0 + $0x3d0] sm:$0xff] }
  0x9f   :  { %495 = vst [vmem:[#allocation2 + $0x118] sm:$0xff] %v162_v30  ;;  %575 = vst [vmem:[#allocation2 + $0x398] sm:$0xff] %v194_v31  ;;  %v133_v31 = vld [vmem:[%s1069_s0 + $0x3e0] sm:$0xff] }
  0xa2   :  { %307 = vxpose.xlu1.b32.cont [9/16] (narrow) %v90_v32, 72  ;;  %275 = vxpose.xlu0.b32.cont [9/16] %v89_v33, 128  ;;  %v163_v34 = vpop.trf.xlu0  ;;  %v195_v35 = vpop.trf.xlu1  ;;  %v135_v33 = vld [vmem:[%s1069_s0 + $0x3f0] sm:$0xff] }
  0xa3   :  { %500 = vst [vmem:[#allocation2 + $0x140] sm:$0xff] %v163_v34  ;;  %580 = vst [vmem:[#allocation2 + $0x3c0] sm:$0xff] %v195_v35  ;;  %v106_v34 = vld [vmem:[%s1069_s0 + $0x308] sm:$0xff] }
  0xa6   :  { %308 = vxpose.xlu1.b32.cont [10/16] (narrow) %v92_v36, 72  ;;  %276 = vxpose.xlu0.b32.cont [10/16] %v91_v37, 128  ;;  %v164_v38 = vpop.trf.xlu0  ;;  %v138_v36 = vld [vmem:[%s1069_s0 + $0x408] sm:$0xff]  ;;  %v108_v37 = vld [vmem:[%s1069_s0 + $0x318] sm:$0xff] }
  0xa7   :  { %505 = vst [vmem:[#allocation2 + $0x168] sm:$0xff] %v164_v38 }
  0xaa   :  { %309 = vxpose.xlu1.b32.cont [11/16] (narrow) %v94_v39, 72  ;;  %277 = vxpose.xlu0.b32.cont [11/16] %v93_v40, 128  ;;  %v165_v41 = vpop.trf.xlu0  ;;  %v110_v40 = vld [vmem:[%s1069_s0 + $0x328] sm:$0xff] }
  0xab   :  { %510 = vst [vmem:[#allocation2 + $0x190] sm:$0xff] %v165_v41 }
  0xae   :  { %310 = vxpose.xlu1.b32.cont [12/16] (narrow) %v96_v42, 72  ;;  %278 = vxpose.xlu0.b32.cont [12/16] %v95_v43, 128  ;;  %v166_v44 = vpop.trf.xlu0  ;;  %v112_v43 = vld [vmem:[%s1069_s0 + $0x338] sm:$0xff] }
  0xaf   :  { %515 = vst [vmem:[#allocation2 + $0x1b8] sm:$0xff] %v166_v44 }
  0xb2   :  { %311 = vxpose.xlu1.b32.cont [13/16] (narrow) %v98_v45, 72  ;;  %279 = vxpose.xlu0.b32.cont [13/16] %v97_v46, 128  ;;  %v167_v47 = vpop.trf.xlu0  ;;  %v114_v46 = vld [vmem:[%s1069_s0 + $0x348] sm:$0xff] }
  0xb3   :  { %520 = vst [vmem:[#allocation2 + $0x1e0] sm:$0xff] %v167_v47 }
  0xb6   :  { %312 = vxpose.xlu1.b32.cont [14/16] (narrow) %v100_v48, 72  ;;  %280 = vxpose.xlu0.b32.cont [14/16] %v99_v49, 128  ;;  %v168_v50 = vpop.trf.xlu0  ;;  %v116_v49 = vld [vmem:[%s1069_s0 + $0x358] sm:$0xff] }
  0xb7   :  { %525 = vst [vmem:[#allocation2 + $0x208] sm:$0xff] %v168_v50 }
  0xba   :  { %313 = vxpose.xlu1.b32.cont [15/16] (narrow) %v102_v51, 72  ;;  %281 = vxpose.xlu0.b32.cont [15/16] %v101_v52, 128  ;;  %v169_v53 = vpop.trf.xlu0  ;;  %v118_v52 = vld [vmem:[%s1069_s0 + $0x368] sm:$0xff] }
  0xbb   :  { %530 = vst [vmem:[#allocation2 + $0x230] sm:$0xff] %v169_v53 }
  0xbe   :  { %314 = vxpose.xlu1.b32.end [16/16] (narrow) %v104_v54, 72  ;;  %282 = vxpose.xlu0.b32.end [16/16] %v103_v55, 128  ;;  %v170_v56 = vpop.trf.xlu0  ;;  %v120_v55 = vld [vmem:[%s1069_s0 + $0x378] sm:$0xff] }
  0xbf   :  { %535 = vst [vmem:[#allocation2 + $0x258] sm:$0xff] %v170_v56 }
  0xc2   :  { %395 = vxpose.xlu1.b32.start.end [1/1] (short) %v137_v57, 128  ;;  %331 = vxpose.xlu0.b32.start [1/16] %v105_v58, 128  ;;  %v219_v59 = vpop.trf.xlu0  ;;  %v251_v60 = vpop.trf.xlu1  ;;  %v122_v58 = vld [vmem:[%s1069_s0 + $0x388] sm:$0xff] }
  0xc3   :  { %460 = vst [vmem:[#allocation2 + $0x8] sm:$0xff] %v219_v59  ;;  %541 = vst [vmem:[#allocation2 + $0x288] sm:$0xff] %v251_v60 }
  0xc6   :  { %332 = vxpose.xlu0.b32.cont [2/16] %v107_v61, 128  ;;  %v220_v62 = vpop.trf.xlu0  ;;  %v252_v63 = vpop.trf.xlu1  ;;  %v124_v61 = vld [vmem:[%s1069_s0 + $0x398] sm:$0xff] }
  0xc7   :  { %466 = vst [vmem:[#allocation2 + $0x30] sm:$0xff] %v220_v62  ;;  %546 = vst [vmem:[#allocation2 + $0x2b0] sm:$0xff] %v252_v63 }
  0xca   :  { %333 = vxpose.xlu0.b32.cont [3/16] %v109_v0, 128  ;;  %v221_v1 = vpop.trf.xlu0  ;;  %v253_v2 = vpop.trf.xlu1  ;;  %v126_v0 = vld [vmem:[%s1069_s0 + $0x3a8] sm:$0xff] }
  0xcb   :  { %471 = vst [vmem:[#allocation2 + $0x58] sm:$0xff] %v221_v1  ;;  %551 = vst [vmem:[#allocation2 + $0x2d8] sm:$0xff] %v253_v2  ;;  %v128_v2 = vld [vmem:[%s1069_s0 + $0x3b8] sm:$0xff] }
  0xce   :  { %334 = vxpose.xlu0.b32.cont [4/16] %v111_v3, 128  ;;  %v222_v4 = vpop.trf.xlu0  ;;  %v254_v5 = vpop.trf.xlu1 }
  0xcf   :  { %476 = vst [vmem:[#allocation2 + $0x80] sm:$0xff] %v222_v4  ;;  %556 = vst [vmem:[#allocation2 + $0x300] sm:$0xff] %v254_v5  ;;  %v130_v4 = vld [vmem:[%s1069_s0 + $0x3c8] sm:$0xff] }
  0xd2   :  { %335 = vxpose.xlu0.b32.cont [5/16] %v113_v6, 128  ;;  %v223_v7 = vpop.trf.xlu0  ;;  %v255_v8 = vpop.trf.xlu1  ;;  %v132_v6 = vld [vmem:[%s1069_s0 + $0x3d8] sm:$0xff] }
  0xd3   :  { %481 = vst [vmem:[#allocation2 + $0xa8] sm:$0xff] %v223_v7  ;;  %561 = vst [vmem:[#allocation2 + $0x328] sm:$0xff] %v255_v8  ;;  %v134_v8 = vld [vmem:[%s1069_s0 + $0x3e8] sm:$0xff] }
  0xd6   :  { %336 = vxpose.xlu0.b32.cont [6/16] %v115_v9, 128  ;;  %v224_v10 = vpop.trf.xlu0  ;;  %v256_v11 = vpop.trf.xlu1 }
  0xd7   :  { %486 = vst [vmem:[#allocation2 + $0xd0] sm:$0xff] %v224_v10  ;;  %566 = vst [vmem:[#allocation2 + $0x350] sm:$0xff] %v256_v11  ;;  %v136_v10 = vld [vmem:[%s1069_s0 + $0x3f8] sm:$0xff]  ;;  %s629_s0 = smov [#allocation2]  }
  0xd8   :  { %s590_s5 = sshll.u32 %s629_s0, 4  ;;  %s591_s5 = int_to_ptr.vmem [resolvable:$true] %s590_s5 }
  0xd9   :  { %s605_s6 = scalar_lea.vmem %s591_s5, 16000  ;;  %p610_p1 = scmp.lt.s32.totalorder %s591_s5, %s591_s5 }
  0xda   :  { %337 = vxpose.xlu0.b32.cont [7/16] %v117_v12, 128  ;;  %v225_v13 = vpop.trf.xlu0  ;;  %v257_v14 = vpop.trf.xlu1  ;;  %p606_p0 = scmp.ne.s32.totalorder %s591_s5, %s605_s6  ;;  %p611_p2 = scmp.lt.s32.totalorder %s605_s6, %s605_s6 }
  0xdb   :  { %491 = vst [vmem:[#allocation2 + $0xf8] sm:$0xff] %v225_v13  ;;  %571 = vst [vmem:[#allocation2 + $0x378] sm:$0xff] %v257_v14 }
  0xdc   :  { %p612_p3 = por %p611_p2, %p610_p1 }
  0xde   :  { %338 = vxpose.xlu0.b32.cont [8/16] %v119_v15, 128  ;;  %v226_v16 = vpop.trf.xlu0  ;;  %v258_v17 = vpop.trf.xlu1  ;;  %p613_p4 = pnand %p612_p3, %p606_p0 }
  0xdf   :  { %496 = vst [vmem:[#allocation2 + $0x120] sm:$0xff] %v226_v16  ;;  %576 = vst [vmem:[#allocation2 + $0x3a0] sm:$0xff] %v258_v17 }
  0xe2   :  { %339 = vxpose.xlu0.b32.cont [9/16] %v121_v18, 128  ;;  %v227_v19 = vpop.trf.xlu0  ;;  %v259_v20 = vpop.trf.xlu1 }
  0xe3   :  { %501 = vst [vmem:[#allocation2 + $0x148] sm:$0xff] %v227_v19  ;;  %581 = vst [vmem:[#allocation2 + $0x3c8] sm:$0xff] %v259_v20 }
  0xe6   :  { %340 = vxpose.xlu0.b32.cont [10/16] %v123_v21, 128  ;;  %v228_v22 = vpop.trf.xlu0 }
  0xe7   :  { %506 = vst [vmem:[#allocation2 + $0x170] sm:$0xff] %v228_v22 }
  0xea   :  { %341 = vxpose.xlu0.b32.cont [11/16] %v125_v23, 128  ;;  %v229_v24 = vpop.trf.xlu0 }
  0xeb   :  { %511 = vst [vmem:[#allocation2 + $0x198] sm:$0xff] %v229_v24 }
  0xee   :  { %342 = vxpose.xlu0.b32.cont [12/16] %v127_v25, 128  ;;  %v230_v26 = vpop.trf.xlu0 }
  0xef   :  { %516 = vst [vmem:[#allocation2 + $0x1c0] sm:$0xff] %v230_v26 }
  0xf2   :  { %343 = vxpose.xlu0.b32.cont [13/16] %v129_v27, 128  ;;  %v231_v28 = vpop.trf.xlu0 }
  0xf3   :  { %521 = vst [vmem:[#allocation2 + $0x1e8] sm:$0xff] %v231_v28 }
  0xf6   :  { %344 = vxpose.xlu0.b32.cont [14/16] %v131_v29, 128  ;;  %v232_v30 = vpop.trf.xlu0 }
  0xf7   :  { %526 = vst [vmem:[#allocation2 + $0x210] sm:$0xff] %v232_v30 }
  0xfa   :  { %345 = vxpose.xlu0.b32.cont [15/16] %v133_v31, 128  ;;  %v233_v32 = vpop.trf.xlu0 }
  0xfb   :  { %531 = vst [vmem:[#allocation2 + $0x238] sm:$0xff] %v233_v32 }
  0xfe   :  { %346 = vxpose.xlu0.b32.end [16/16] %v135_v33, 128  ;;  %v234_v35 = vpop.trf.xlu0 }
  0xff   :  { %536 = vst [vmem:[#allocation2 + $0x260] sm:$0xff] %v234_v35  ;;  %363 = vxpose.xlu1.b32.start [1/16] (narrow) %v106_v34, 72 }
 0x102   :  { %427 = vxpose.xlu0.b32.start.end [1/1] (short) (narrow) %v138_v36, 72  ;;  %v283_v38 = vpop.trf.xlu0  ;;  %v315_v39 = vpop.trf.xlu1 }
 0x103   :  { %461 = vst [vmem:[#allocation2 + $0x10] sm:$0xff] %v283_v38  ;;  %364 = vxpose.xlu1.b32.cont [2/16] (narrow) %v108_v37, 72  ;;  %542 = vst [vmem:[#allocation2 + $0x290] sm:$0xff] %v315_v39 }
 0x106   :  { %v284_v41 = vpop.trf.xlu0  ;;  %v316_v42 = vpop.trf.xlu1 }
 0x107   :  { %467 = vst [vmem:[#allocation2 + $0x38] sm:$0xff] %v284_v41  ;;  %365 = vxpose.xlu1.b32.cont [3/16] (narrow) %v110_v40, 72  ;;  %547 = vst [vmem:[#allocation2 + $0x2b8] sm:$0xff] %v316_v42 }
 0x10a   :  { %v285_v44 = vpop.trf.xlu0  ;;  %v317_v45 = vpop.trf.xlu1 }
 0x10b   :  { %472 = vst [vmem:[#allocation2 + $0x60] sm:$0xff] %v285_v44  ;;  %366 = vxpose.xlu1.b32.cont [4/16] (narrow) %v112_v43, 72  ;;  %552 = vst [vmem:[#allocation2 + $0x2e0] sm:$0xff] %v317_v45 }
 0x10e   :  { %v286_v47 = vpop.trf.xlu0  ;;  %v318_v48 = vpop.trf.xlu1 }
 0x10f   :  { %477 = vst [vmem:[#allocation2 + $0x88] sm:$0xff] %v286_v47  ;;  %367 = vxpose.xlu1.b32.cont [5/16] (narrow) %v114_v46, 72  ;;  %557 = vst [vmem:[#allocation2 + $0x308] sm:$0xff] %v318_v48 }
 0x112   :  { %v287_v50 = vpop.trf.xlu0  ;;  %v319_v51 = vpop.trf.xlu1 }
 0x113   :  { %482 = vst [vmem:[#allocation2 + $0xb0] sm:$0xff] %v287_v50  ;;  %368 = vxpose.xlu1.b32.cont [6/16] (narrow) %v116_v49, 72  ;;  %562 = vst [vmem:[#allocation2 + $0x330] sm:$0xff] %v319_v51 }
 0x116   :  { %v288_v53 = vpop.trf.xlu0  ;;  %v320_v54 = vpop.trf.xlu1 }
 0x117   :  { %487 = vst [vmem:[#allocation2 + $0xd8] sm:$0xff] %v288_v53  ;;  %369 = vxpose.xlu1.b32.cont [7/16] (narrow) %v118_v52, 72  ;;  %567 = vst [vmem:[#allocation2 + $0x358] sm:$0xff] %v320_v54 }
 0x11a   :  { %v289_v56 = vpop.trf.xlu0  ;;  %v321_v57 = vpop.trf.xlu1 }
 0x11b   :  { %492 = vst [vmem:[#allocation2 + $0x100] sm:$0xff] %v289_v56  ;;  %370 = vxpose.xlu1.b32.cont [8/16] (narrow) %v120_v55, 72  ;;  %572 = vst [vmem:[#allocation2 + $0x380] sm:$0xff] %v321_v57 }
 0x11e   :  { %v290_v59 = vpop.trf.xlu0  ;;  %v322_v60 = vpop.trf.xlu1 }
 0x11f   :  { %497 = vst [vmem:[#allocation2 + $0x128] sm:$0xff] %v290_v59  ;;  %371 = vxpose.xlu1.b32.cont [9/16] (narrow) %v122_v58, 72  ;;  %577 = vst [vmem:[#allocation2 + $0x3a8] sm:$0xff] %v322_v60 }
 0x122   :  { %v291_v62 = vpop.trf.xlu0  ;;  %v323_v63 = vpop.trf.xlu1 }
 0x123   :  { %502 = vst [vmem:[#allocation2 + $0x150] sm:$0xff] %v291_v62  ;;  %372 = vxpose.xlu1.b32.cont [10/16] (narrow) %v124_v61, 72  ;;  %582 = vst [vmem:[#allocation2 + $0x3d0] sm:$0xff] %v323_v63 }
 0x126   :  { %v292_v1 = vpop.trf.xlu0 }
 0x127   :  { %507 = vst [vmem:[#allocation2 + $0x178] sm:$0xff] %v292_v1  ;;  %373 = vxpose.xlu1.b32.cont [11/16] (narrow) %v126_v0, 72 }
 0x12a   :  { %v293_v3 = vpop.trf.xlu0 }
 0x12b   :  { %512 = vst [vmem:[#allocation2 + $0x1a0] sm:$0xff] %v293_v3  ;;  %374 = vxpose.xlu1.b32.cont [12/16] (narrow) %v128_v2, 72 }
 0x12e   :  { %v294_v5 = vpop.trf.xlu0 }
 0x12f   :  { %517 = vst [vmem:[#allocation2 + $0x1c8] sm:$0xff] %v294_v5  ;;  %375 = vxpose.xlu1.b32.cont [13/16] (narrow) %v130_v4, 72 }
 0x132   :  { %v295_v7 = vpop.trf.xlu0 }
 0x133   :  { %522 = vst [vmem:[#allocation2 + $0x1f0] sm:$0xff] %v295_v7  ;;  %376 = vxpose.xlu1.b32.cont [14/16] (narrow) %v132_v6, 72 }
 0x136   :  { %v296_v9 = vpop.trf.xlu0 }
 0x137   :  { %527 = vst [vmem:[#allocation2 + $0x218] sm:$0xff] %v296_v9  ;;  %377 = vxpose.xlu1.b32.cont [15/16] (narrow) %v134_v8, 72 }
 0x13a   :  { %v297_v11 = vpop.trf.xlu0 }
 0x13b   :  { %532 = vst [vmem:[#allocation2 + $0x240] sm:$0xff] %v297_v11  ;;  %378 = vxpose.xlu1.b32.end [16/16] (narrow) %v136_v10, 72 }
 0x13e   :  { %v298_v12 = vpop.trf.xlu0 }
 0x13f   :  { %537 = vst [vmem:[#allocation2 + $0x268] sm:$0xff] %v298_v12 }
 0x142   :  { %v411_v13 = vpop.trf.xlu1  ;;  %v347_v14 = vpop.trf.xlu0 }
 0x143   :  { %464 = vst.msk [vmem:[#allocation2 + $0x20] sm:$0xff] %vm463_vm0, %v411_v13  ;;  %462 = vst [vmem:[#allocation2 + $0x18] sm:$0xff] %v347_v14 }
 0x146   :  { %v412_v15 = vpop.trf.xlu1  ;;  %v348_v16 = vpop.trf.xlu0 }
 0x147   :  { %469 = vst.msk [vmem:[#allocation2 + $0x48] sm:$0xff] %vm463_vm0, %v412_v15  ;;  %468 = vst [vmem:[#allocation2 + $0x40] sm:$0xff] %v348_v16 }
 0x14a   :  { %v413_v17 = vpop.trf.xlu1  ;;  %v349_v18 = vpop.trf.xlu0 }
 0x14b   :  { %474 = vst.msk [vmem:[#allocation2 + $0x70] sm:$0xff] %vm463_vm0, %v413_v17  ;;  %473 = vst [vmem:[#allocation2 + $0x68] sm:$0xff] %v349_v18 }
 0x14e   :  { %v414_v19 = vpop.trf.xlu1  ;;  %v350_v20 = vpop.trf.xlu0 }
 0x14f   :  { %479 = vst.msk [vmem:[#allocation2 + $0x98] sm:$0xff] %vm463_vm0, %v414_v19  ;;  %478 = vst [vmem:[#allocation2 + $0x90] sm:$0xff] %v350_v20 }
 0x152   :  { %v415_v21 = vpop.trf.xlu1  ;;  %v351_v22 = vpop.trf.xlu0 }
 0x153   :  { %484 = vst.msk [vmem:[#allocation2 + $0xc0] sm:$0xff] %vm463_vm0, %v415_v21  ;;  %483 = vst [vmem:[#allocation2 + $0xb8] sm:$0xff] %v351_v22 }
 0x156   :  { %v416_v23 = vpop.trf.xlu1  ;;  %v352_v24 = vpop.trf.xlu0 }
 0x157   :  { %489 = vst.msk [vmem:[#allocation2 + $0xe8] sm:$0xff] %vm463_vm0, %v416_v23  ;;  %488 = vst [vmem:[#allocation2 + $0xe0] sm:$0xff] %v352_v24 }
 0x15a   :  { %v417_v25 = vpop.trf.xlu1  ;;  %v353_v26 = vpop.trf.xlu0 }
 0x15b   :  { %494 = vst.msk [vmem:[#allocation2 + $0x110] sm:$0xff] %vm463_vm0, %v417_v25  ;;  %493 = vst [vmem:[#allocation2 + $0x108] sm:$0xff] %v353_v26 }
 0x15e   :  { %v418_v27 = vpop.trf.xlu1  ;;  %v354_v28 = vpop.trf.xlu0 }
 0x15f   :  { %499 = vst.msk [vmem:[#allocation2 + $0x138] sm:$0xff] %vm463_vm0, %v418_v27  ;;  %498 = vst [vmem:[#allocation2 + $0x130] sm:$0xff] %v354_v28 }
 0x162   :  { %v419_v29 = vpop.trf.xlu1  ;;  %v355_v30 = vpop.trf.xlu0 }
 0x163   :  { %504 = vst.msk [vmem:[#allocation2 + $0x160] sm:$0xff] %vm463_vm0, %v419_v29  ;;  %503 = vst [vmem:[#allocation2 + $0x158] sm:$0xff] %v355_v30 }
 0x166   :  { %v420_v31 = vpop.trf.xlu1  ;;  %v356_v32 = vpop.trf.xlu0 }
 0x167   :  { %509 = vst.msk [vmem:[#allocation2 + $0x188] sm:$0xff] %vm463_vm0, %v420_v31  ;;  %508 = vst [vmem:[#allocation2 + $0x180] sm:$0xff] %v356_v32 }
 0x16a   :  { %v421_v33 = vpop.trf.xlu1  ;;  %v357_v34 = vpop.trf.xlu0 }
 0x16b   :  { %514 = vst.msk [vmem:[#allocation2 + $0x1b0] sm:$0xff] %vm463_vm0, %v421_v33  ;;  %513 = vst [vmem:[#allocation2 + $0x1a8] sm:$0xff] %v357_v34 }
 0x16e   :  { %v422_v35 = vpop.trf.xlu1  ;;  %v358_v36 = vpop.trf.xlu0 }
 0x16f   :  { %519 = vst.msk [vmem:[#allocation2 + $0x1d8] sm:$0xff] %vm463_vm0, %v422_v35  ;;  %518 = vst [vmem:[#allocation2 + $0x1d0] sm:$0xff] %v358_v36 }
 0x172   :  { %v423_v37 = vpop.trf.xlu1  ;;  %v359_v38 = vpop.trf.xlu0 }
 0x173   :  { %524 = vst.msk [vmem:[#allocation2 + $0x200] sm:$0xff] %vm463_vm0, %v423_v37  ;;  %523 = vst [vmem:[#allocation2 + $0x1f8] sm:$0xff] %v359_v38 }
 0x176   :  { %v424_v39 = vpop.trf.xlu1  ;;  %v360_v40 = vpop.trf.xlu0 }
 0x177   :  { %529 = vst.msk [vmem:[#allocation2 + $0x228] sm:$0xff] %vm463_vm0, %v424_v39  ;;  %528 = vst [vmem:[#allocation2 + $0x220] sm:$0xff] %v360_v40 }
 0x17a   :  { %v425_v41 = vpop.trf.xlu1  ;;  %v361_v42 = vpop.trf.xlu0 }
 0x17b   :  { %534 = vst.msk [vmem:[#allocation2 + $0x250] sm:$0xff] %vm463_vm0, %v425_v41  ;;  %533 = vst [vmem:[#allocation2 + $0x248] sm:$0xff] %v361_v42 }
 0x17e   :  { %v426_v43 = vpop.trf.xlu1  ;;  %v362_v44 = vpop.trf.xlu0 }
 0x17f   :  { %539 = vst.msk [vmem:[#allocation2 + $0x278] sm:$0xff] %vm463_vm0, %v426_v43  ;;  %538 = vst [vmem:[#allocation2 + $0x270] sm:$0xff] %v362_v44 }
 0x182   :  { %v379_v45 = vpop.trf.xlu1  ;;  %v443_v46 = vpop.trf.xlu0 }
 0x183   :  { %543 = vst [vmem:[#allocation2 + $0x298] sm:$0xff] %v379_v45  ;;  %544 = vst.msk [vmem:[#allocation2 + $0x2a0] sm:$0xff] %vm463_vm0, %v443_v46 }
 0x186   :  { %v380_v47 = vpop.trf.xlu1  ;;  %v444_v48 = vpop.trf.xlu0 }
 0x187   :  { %548 = vst [vmem:[#allocation2 + $0x2c0] sm:$0xff] %v380_v47  ;;  %549 = vst.msk [vmem:[#allocation2 + $0x2c8] sm:$0xff] %vm463_vm0, %v444_v48 }
 0x18a   :  { %v381_v49 = vpop.trf.xlu1  ;;  %v445_v50 = vpop.trf.xlu0 }
 0x18b   :  { %553 = vst [vmem:[#allocation2 + $0x2e8] sm:$0xff] %v381_v49  ;;  %554 = vst.msk [vmem:[#allocation2 + $0x2f0] sm:$0xff] %vm463_vm0, %v445_v50 }
 0x18e   :  { %v382_v51 = vpop.trf.xlu1  ;;  %v446_v52 = vpop.trf.xlu0 }
 0x18f   :  { %558 = vst [vmem:[#allocation2 + $0x310] sm:$0xff] %v382_v51  ;;  %559 = vst.msk [vmem:[#allocation2 + $0x318] sm:$0xff] %vm463_vm0, %v446_v52 }
 0x192   :  { %v383_v53 = vpop.trf.xlu1  ;;  %v447_v54 = vpop.trf.xlu0 }
 0x193   :  { %563 = vst [vmem:[#allocation2 + $0x338] sm:$0xff] %v383_v53  ;;  %564 = vst.msk [vmem:[#allocation2 + $0x340] sm:$0xff] %vm463_vm0, %v447_v54 }
 0x196   :  { %v384_v55 = vpop.trf.xlu1  ;;  %v448_v56 = vpop.trf.xlu0 }
 0x197   :  { %568 = vst [vmem:[#allocation2 + $0x360] sm:$0xff] %v384_v55  ;;  %569 = vst.msk [vmem:[#allocation2 + $0x368] sm:$0xff] %vm463_vm0, %v448_v56 }
 0x19a   :  { %v385_v57 = vpop.trf.xlu1  ;;  %v449_v58 = vpop.trf.xlu0 }
 0x19b   :  { %573 = vst [vmem:[#allocation2 + $0x388] sm:$0xff] %v385_v57  ;;  %574 = vst.msk [vmem:[#allocation2 + $0x390] sm:$0xff] %vm463_vm0, %v449_v58 }
 0x19e   :  { %v386_v59 = vpop.trf.xlu1  ;;  %v450_v60 = vpop.trf.xlu0 }
 0x19f   :  { %578 = vst [vmem:[#allocation2 + $0x3b0] sm:$0xff] %v386_v59  ;;  %579 = vst.msk [vmem:[#allocation2 + $0x3b8] sm:$0xff] %vm463_vm0, %v450_v60 }
 0x1a2   :  { %v387_v61 = vpop.trf.xlu1  ;;  %v451_v62 = vpop.trf.xlu0 }
 0x1a3   :  { %583 = vst [vmem:[#allocation2 + $0x3d8] sm:$0xff] %v387_v61  ;;  %584 = vst.msk [vmem:[#allocation2 + $0x3e0] sm:$0xff] %vm463_vm0, %v451_v62 }
 0x1a4   :  { %616 = shalt.err (!%p613_p4)
}
 0x1a5   :  { %s617_s9 = scalar_lea.hbm %s1070_s1, 16000 }
 0x1a6   :  { %p618_p5 = scmp.ne.s32.totalorder %s1070_s1, %s617_s9  ;;  %p621_p6 = scmp.lt.u32.totalorder %s617_s9, %s1070_s1 }
 0x1a8   :  { %p623_p7 = pnand %p621_p6, %p618_p5 }
 0x1aa   :  { %626 = shalt.err (!%p623_p7)
}
 0x1ab   :  { %s630_s14 = smov 640   ;;  %s631_s15 = smov 40  }
 0x1ac   :  { %596 = dma.vmem_to_hbm [thread:$0]  %s591_s5, 16000, %s1070_s1, [#allocation3], %s630_s14, %s630_s14, %s631_s15  }
 0x1ad   :  { %627 = dma.done.wait [#allocation3], 16000  }
 0x1ae   :  { %628 = vsyncadd [#allocation3], 4294951296 }
 0x1af   :  { %600 = vsyncpa [#allocation3], 1 }

</bundles_post_ra>
